<compile_context>
chip_gen: v5e
topology: v5e:2x2
jax: 0.10.0
libtpu: 0.0.40
codegen_flags: <defaults>
</compile_context>

<pallas_src>
from typing import Optional, Union

import jax
import jax.numpy as jnp
from jax.experimental import pallas as pl
from jax.experimental.pallas import tpu as pltpu

_LANE = 128


def _denorm_kernel(x_ref, std_ref, mean_ref, o_ref):
    # x_ref/o_ref: (bc_block, rows_per_tile, 128) tile (native input dtype).
    # std_ref/mean_ref: (bc_block, 1, 1) float32 per-plane scalars.
    x = x_ref[...].astype(jnp.float32)
    o_ref[...] = (x * std_ref[...] + mean_ref[...]).astype(o_ref.dtype)


def _target_tile_bytes() -> int:
    """Per-generation tile-size target (bytes). Safe default: 2 MiB."""
    try:
        kind = jax.devices()[0].device_kind.lower()
    except Exception:  # pragma: no cover
        return 2 << 20
    if "v5" in kind:
        return 1 << 20      # v5e: 16 MiB scoped-VMEM default; 1 MiB tiles are enough
    if "v7" in kind:
        return 4 << 20      # v7x: 3.2 TB/s HBM; bigger tiles amortize per-step cost
    return 2 << 20          # v6e and everything else


def _per_bc_scalars(v, B: int, C: int) -> jnp.ndarray:
    """Broadcast scalar / (C,) / (1,C) / (B,C) / (B,1) mean/std to flat (B*C,) f32."""
    arr = jnp.asarray(v, dtype=jnp.float32)
    if arr.ndim == 0:
        arr = arr.reshape(1, 1)
    elif arr.ndim == 1:
        arr = arr.reshape(1, arr.shape[0])
    else:
        arr = arr.reshape(-1, arr.shape[-1])
    return jnp.broadcast_to(arr, (B, C)).reshape(B * C)


def denormalize_pallas(data: jnp.ndarray,
                       mean: Union[jnp.ndarray, float],
                       std: Union[jnp.ndarray, float],
                       *,
                       target_tile_bytes: Optional[int] = None) -> jnp.ndarray:
    shape = data.shape
    B, C = int(shape[0]), int(shape[1])
    hw = 1
    for s in shape[2:]:
        hw *= int(s)

    std_bc = _per_bc_scalars(std, B, C)     # (B*C,) float32
    mean_bc = _per_bc_scalars(mean, B, C)   # (B*C,) float32

    is_float = jnp.issubdtype(data.dtype, jnp.floating)

    # ---- fallback: fully fused single-pass jnp (XLA) ----------------------
    # Used when the spatial size is not lane-aligned (a Pallas path would need
    # an extra pad + slice HBM pass) or the dtype is integer (promoted to f32;
    # the PyTorch reference would silently truncate integer outputs).
    if hw == 0 or (hw % _LANE) != 0 or not is_float:
        xf = data.reshape(B * C, hw).astype(jnp.float32)
        out = xf * std_bc[:, None] + mean_bc[:, None]
        out_dtype = data.dtype if is_float else jnp.float32
        return out.astype(out_dtype).reshape(shape)

    # ---- Pallas path ------------------------------------------------------
    itemsize = jnp.dtype(data.dtype).itemsize
    rows = hw // _LANE                                  # lane-dense rows per plane
    plane_bytes = rows * _LANE * itemsize
    target = int(target_tile_bytes) if target_tile_bytes else _target_tile_bytes()

    if plane_bytes >= target:
        # Large planes: one plane per step, chunk the row axis.
        bc_block = 1
        rows_per_tile = max(32, (target // (_LANE * itemsize)) // 32 * 32)
        rows_per_tile = min(rows_per_tile, rows)
        num_chunks = -(-rows // rows_per_tile)          # partial edge block is masked
    else:
        # Small planes: merge several (b, c) planes per grid step.
        rows_per_tile = rows                            # == full dim (no 8-mult needed)
        num_chunks = 1
        bc_block = max(1, min(B * C, target // max(plane_bytes, 1), 256))
    num_bc = -(-(B * C) // bc_block)                    # partial edge block is masked

    x3d = data.reshape(B * C, rows, _LANE)
    std3d = std_bc.reshape(B * C, 1, 1)
    mean3d = mean_bc.reshape(B * C, 1, 1)

    out3d = pl.pallas_call(
        _denorm_kernel,
        out_shape=jax.ShapeDtypeStruct((B * C, rows, _LANE), data.dtype),
        grid_spec=pltpu.PrefetchScalarGridSpec(
            num_scalar_prefetch=0,
            grid=(num_bc, num_chunks),
            in_specs=[
                pl.BlockSpec((bc_block, rows_per_tile, _LANE),
                             lambda p, j: (p, j, 0)),
                pl.BlockSpec((bc_block, 1, 1), lambda p, j: (p, 0, 0)),
                pl.BlockSpec((bc_block, 1, 1), lambda p, j: (p, 0, 0)),
            ],
            out_specs=pl.BlockSpec((bc_block, rows_per_tile, _LANE),
                                   lambda p, j: (p, j, 0)),
        ),
        compiler_params=pltpu.CompilerParams(
            dimension_semantics=("parallel", "parallel")),
    )(x3d, std3d, mean3d)

    return out3d.reshape(shape)


class Denormalize:
    """JAX/Pallas equivalent of the PyTorch Denormalize module."""

    def __init__(self, mean, std):
        self.mean = mean
        self.std = std

    def __repr__(self):
        return f"{self.__class__.__name__}(mean={self.mean}, std={self.std})"

    def __call__(self, image: jnp.ndarray) -> jnp.ndarray:
        return denormalize_pallas(image, self.mean, self.std)


if __name__ == "__main__":
    key = jax.random.PRNGKey(0)
    k1, k2, k3, k4, k5, k6 = jax.random.split(key, 6)

    # Case 1: scalar mean/std, (2,4,16,16) f32 -> Pallas path (planes merged,
    # bc_block = 8, single grid step).
    B, C, H, W = 2, 4, 16, 16
    x = jax.random.uniform(k1, (B, C, H, W), dtype=jnp.float32)
    out1 = jax.block_until_ready(Denormalize(0.0, 255.0)(x))
    ref1 = x * 255.0
    assert out1.shape == x.shape and out1.dtype == x.dtype
    assert jnp.allclose(out1, ref1, rtol=1e-6, atol=1e-5)

    # Case 2: per-(batch, channel) mean/std of shape (B, C) -> Pallas path.
    mean2 = jax.random.normal(k2, (B, C), dtype=jnp.float32)
    std2 = 255.0 * jnp.ones((B, C), dtype=jnp.float32)
    out2 = jax.block_until_ready(Denormalize(mean2, std2)(x))
    ref2 = x * std2[:, :, None, None] + mean2[:, :, None, None]
    assert jnp.allclose(out2, ref2, rtol=1e-6, atol=1e-4)

    # Case 3: large planes with a forced 1 MiB tile target -> chunked row axis
    # with a partial (masked) edge block, no wrapper pad/slice.
    x3 = jax.random.uniform(k3, (1, 3, 512, 640), dtype=jnp.float32)
    mean3 = jnp.asarray([0.1, -0.2, 0.3], dtype=jnp.float32)
    std3 = jnp.asarray([255.0, 128.0, 64.0], dtype=jnp.float32)
    out3 = jax.block_until_ready(
        denormalize_pallas(x3, mean3, std3, target_tile_bytes=1 << 20))
    ref3 = x3 * std3[None, :, None, None] + mean3[None, :, None, None]
    assert jnp.allclose(out3, ref3, rtol=1e-5, atol=1e-3)

    # Case 4: bf16 input, per-channel (C,) mean/std -> Pallas path, native-dtype
    # DMA with in-kernel f32 FMA and bf16 store.
    x4 = jax.random.uniform(k4, (2, 4, 32, 32), dtype=jnp.float32).astype(jnp.bfloat16)
    mean4 = jnp.arange(4, dtype=jnp.float32)
    std4 = 255.0 * jnp.ones((4,), dtype=jnp.float32)
    out4 = jax.block_until_ready(Denormalize(mean4, std4)(x4))
    ref4 = (x4.astype(jnp.float32) * std4[None, :, None, None]
            + mean4[None, :, None, None]).astype(jnp.bfloat16)
    assert out4.dtype == jnp.bfloat16
    assert jnp.allclose(out4.astype(jnp.float32), ref4.astype(jnp.float32),
                        rtol=1e-2, atol=2.0)

    # Case 5: docstring shapes with non-lane-aligned spatial size -> fused jnp
    # fallback (an extra pad+slice HBM pass would cost more than it saves).
    x5 = jax.random.uniform(k5, (1, 4, 3, 3), dtype=jnp.float32)
    out5 = jax.block_until_ready(Denormalize(0.0, 255.0)(x5))
    assert out5.shape == x5.shape
    assert jnp.allclose(out5, x5 * 255.0, rtol=1e-6, atol=1e-5)

    x5b = jax.random.uniform(k5, (1, 4, 3, 3, 3), dtype=jnp.float32)
    mean5 = jnp.zeros((1, 4), dtype=jnp.float32)
    std5 = 255.0 * jnp.ones((1, 4), dtype=jnp.float32)
    out5b = jax.block_until_ready(Denormalize(mean5, std5)(x5b))
    assert out5b.shape == x5b.shape
    assert jnp.allclose(out5b, x5b * 255.0, rtol=1e-6, atol=1e-5)

    # Case 6: integer (uint8) input -> fused jnp fallback, promoted to float32.
    # TODO(synk): PyTorch reference would keep (and truncate to) the integer
    # dtype; we intentionally return float32 for integer inputs.
    x6 = jax.random.randint(k6, (2, 3, 16, 16), 0, 256, dtype=jnp.int32).astype(jnp.uint8)
    out6 = jax.block_until_ready(Denormalize(0.5, 2.0)(x6))
    assert out6.dtype == jnp.float32
    assert jnp.allclose(out6, x6.astype(jnp.float32) * 2.0 + 0.5, rtol=1e-6, atol=1e-5)

    print("KERNEL_OK")
</pallas_src>

<mosaic_0001>
module attributes {stable_mosaic.version = 11 : i64} {
  func.func @_denorm_kernel(%arg0: i32, %arg1: i32, %arg2: memref<8x2x128xf32, #tpu.memory_space<vmem>>, %arg3: memref<8x1x1xf32, #tpu.memory_space<vmem>>, %arg4: memref<8x1x1xf32, #tpu.memory_space<vmem>>, %arg5: memref<8x2x128xf32, #tpu.memory_space<vmem>>) attributes {dimension_semantics = [#tpu.dimension_semantics<parallel>, #tpu.dimension_semantics<parallel>], iteration_bounds = array<i64: 1, 1>, scalar_prefetch = 0 : i64, scratch_operands = 0 : i64, tpu.core_type = #tpu.core_type<tc>, window_params = [{transform_indices = @transform_0, window_bounds = array<i64: 8, 2, 128>}, {transform_indices = @transform_1, window_bounds = array<i64: 8, 1, 1>}, {transform_indices = @transform_2, window_bounds = array<i64: 8, 1, 1>}, {transform_indices = @transform_3, window_bounds = array<i64: 8, 2, 128>}]} {
    %c0 = arith.constant 0 : index
    %c0_0 = arith.constant 0 : index
    %c0_1 = arith.constant 0 : index
    %0 = vector.load %arg2[%c0, %c0_0, %c0_1] : memref<8x2x128xf32, #tpu.memory_space<vmem>>, vector<8x2x128xf32>
    %c0_2 = arith.constant 0 : index
    %c0_3 = arith.constant 0 : index
    %c0_4 = arith.constant 0 : index
    %1 = vector.load %arg3[%c0_2, %c0_3, %c0_4] : memref<8x1x1xf32, #tpu.memory_space<vmem>>, vector<8x1x1xf32>
    %2 = vector.broadcast %1 : vector<8x1x1xf32> to vector<8x2x128xf32>
    %3 = arith.mulf %0, %2 : vector<8x2x128xf32>
    %c0_5 = arith.constant 0 : index
    %c0_6 = arith.constant 0 : index
    %c0_7 = arith.constant 0 : index
    %4 = vector.load %arg4[%c0_5, %c0_6, %c0_7] : memref<8x1x1xf32, #tpu.memory_space<vmem>>, vector<8x1x1xf32>
    %5 = vector.broadcast %4 : vector<8x1x1xf32> to vector<8x2x128xf32>
    %6 = arith.addf %3, %5 : vector<8x2x128xf32>
    %c0_8 = arith.constant 0 : index
    %c0_9 = arith.constant 0 : index
    %c0_10 = arith.constant 0 : index
    %7 = vector.load %arg5[%c0_8, %c0_9, %c0_10] : memref<8x2x128xf32, #tpu.memory_space<vmem>>, vector<8x2x128xf32>
    tpu.vector_store %arg5[%c0_8, %c0_9, %c0_10], %6 {strides = array<i32>} : memref<8x2x128xf32, #tpu.memory_space<vmem>>, vector<8x2x128xf32>,
    return
  }
  func.func @transform_0(%arg0: i32, %arg1: i32) -> (i32, i32, i32) {
    %c0_i32 = arith.constant 0 : i32
    %c0_i32_0 = arith.constant 0 : i32
    return %arg0, %arg1, %c0_i32 : i32, i32, i32
  }
  func.func @transform_1(%arg0: i32, %arg1: i32) -> (i32, i32, i32) {
    %c0_i32 = arith.constant 0 : i32
    %c0_i32_0 = arith.constant 0 : i32
    %c0_i32_1 = arith.constant 0 : i32
    return %arg0, %c0_i32, %c0_i32_0 : i32, i32, i32
  }
  func.func @transform_2(%arg0: i32, %arg1: i32) -> (i32, i32, i32) {
    %c0_i32 = arith.constant 0 : i32
    %c0_i32_0 = arith.constant 0 : i32
    %c0_i32_1 = arith.constant 0 : i32
    return %arg0, %c0_i32, %c0_i32_0 : i32, i32, i32
  }
  func.func @transform_3(%arg0: i32, %arg1: i32) -> (i32, i32, i32) {
    %c0_i32 = arith.constant 0 : i32
    %c0_i32_0 = arith.constant 0 : i32
    return %arg0, %arg1, %c0_i32 : i32, i32, i32
  }
}

</mosaic_0001>

<bundles_post_ra>
// kernel: tpu_custom_call.1
= control target key start
LH: loop header
LB: loop body
LE: loop exit
PB: predicated region body
PF: predicated region fallthrough
CT: control target
= control target key end

     0   :  { %v226_v1 = vmov 0   ;;  %s325_s0 = inlined_call_operand.vmem [shape: f32[8,2,128], index: 0, kind: input, shape index: {}]   ;;  %s326_s1 = inlined_call_operand.vmem [shape: f32[8,1,1], index: 1, kind: input, shape index: {}]   ;;  %s327_s2 = inlined_call_operand.vmem [shape: f32[8,1,1], index: 2, kind: input, shape index: {}]   ;;  %s328_s3 = inlined_call_operand.hbm [shape: f32[8,2,128], index: 3, kind: output, shape index: {}]  }
   0x1   :  { %v184_v0 = vld [vmem:[%s326_s1 + $0x4] ss:$0 sm:$0xff]  ;;  %183 = vset.pattern.permute.xlu2 %v226_v1  ;;  %182 = vset.pattern.permute.xlu1 %v226_v1  ;;  %v185_v2 = vld [vmem:[%s326_s1 + $0x2] ss:$0 sm:$0xff]  ;;  %v186_v3 = vld [vmem:[%s326_s1] ss:$0 sm:$0xff] }
   0x2   :  { %181 = vset.pattern.permute.xlu0 %v226_v1  ;;  %64 = vperm.xlu2 %183, %v184_v0   ;;  %v187_v4 = vld [vmem:[%s326_s1 + $0x5] ss:$0 sm:$0xff]  ;;  %v188_v5 = vld [vmem:[%s326_s1 + $0x3] ss:$0 sm:$0xff]  ;;  %v189_v6 = vld [vmem:[%s326_s1 + $0x1] ss:$0 sm:$0xff] }
   0x3   :  { %56 = vperm.xlu1 %182, %v185_v2   ;;  %48 = vperm.xlu0 %181, %v186_v3  }
   0xa   :  { %68 = vperm.xlu2 %183, %v187_v4  }
   0xb   :  { %60 = vperm.xlu1 %182, %v188_v5  }
   0xc   :  { %8 = vsyncpa [#allocation3], 0  ;;  %52 = vperm.xlu0 %181, %v189_v6   ;;  %v190_v7 = vld [vmem:[%s327_s2] ss:$0 sm:$0xff]  ;;  %v191_v8 = vld [vmem:[%s326_s1 + $0x7] ss:$0 sm:$0xff] }
   0xd   :  { %v192_v9 = vld [vmem:[%s326_s1 + $0x6] ss:$0 sm:$0xff]  ;;  %v193_v10 = vld [vmem:[%s327_s2 + $0x3] ss:$0 sm:$0xff]  ;;  %v194_v11 = vld [vmem:[%s327_s2 + $0x2] ss:$0 sm:$0xff] }
   0xe   :  { %v195_v12 = vld [vmem:[%s327_s2 + $0x1] ss:$0 sm:$0xff]  ;;  %v196_v13 = vld [vmem:[%s327_s2 + $0x6] ss:$0 sm:$0xff]  ;;  %v197_v14 = vld [vmem:[%s327_s2 + $0x5] ss:$0 sm:$0xff] }
   0xf   :  { %v198_v15 = vld [vmem:[%s327_s2 + $0x4] ss:$0 sm:$0xff]  ;;  %v199_v16 = vld [vmem:[%s327_s2 + $0x7] ss:$0 sm:$0xff]  ;;  %v15_v20 = vld [vmem:[%s325_s0] sm:$0x3] }
  0x10   :  { %v18_v25 = vld [vmem:[%s325_s0 + $0x6] sm:$0x3]  ;;  %v21_v31 = vld [vmem:[%s325_s0 + $0xc] sm:$0x3]  ;;  %v17_v36 = vld [vmem:[%s325_s0 + $0x4] sm:$0x3] }
  0x11   :  { %v16_v38 = vld [vmem:[%s325_s0 + $0x2] sm:$0x3]  ;;  %v20_v45 = vld [vmem:[%s325_s0 + $0xa] sm:$0x3]  ;;  %v19_v46 = vld [vmem:[%s325_s0 + $0x8] sm:$0x3] }
  0x12   :  { %112 = vperm.xlu2 %183, %v190_v7   ;;  %v22_v53 = vld [vmem:[%s325_s0 + $0xe] sm:$0x3]  ;;  %s227_s4 = smov [#allocation2]   ;;  %s165_s8 = sshll.u32 %s328_s3, 4  ;;  %s166_s8 = int_to_ptr.hbm [resolvable:$true] %s165_s8 }
  0x13   :  { %76 = vperm.xlu1 %182, %v191_v8   ;;  %s163_s5 = sshll.u32 %s227_s4, 4  ;;  %s228_s9 = smov 32   ;;  %s164_s5 = int_to_ptr.vmem [resolvable:$true] %s163_s5 }
  0x14   :  { %72 = vperm.xlu0 %181, %v192_v9   ;;  %s229_s1 = smov 2  }
  0x1a   :  { %124 = vperm.xlu2 %183, %v193_v10  }
  0x1b   :  { %120 = vperm.xlu1 %182, %v194_v11  }
  0x1c   :  { %116 = vperm.xlu0 %181, %v195_v12  }
  0x22   :  { %136 = vperm.xlu2 %183, %v196_v13  }
  0x23   :  { %132 = vperm.xlu1 %182, %v197_v14  }
  0x24   :  { %128 = vperm.xlu0 %181, %v198_v15  }
  0x2c   :  { %140 = vperm.xlu0 %181, %v199_v16  }
  0x5c   :  { %v65_v17 = vpop.permute.xlu2 %64 }
  0x5d   :  { %v83_v48 = vmul.f32 %v65_v17, %v19_v46 }
  0x64   :  { %v69_v18 = vpop.permute.xlu2 %68 }
  0x65   :  { %v84_v47 = vmul.f32 %v69_v18, %v20_v45 }
  0x6c   :  { %v113_v19 = vpop.permute.xlu2 %112 }
  0x74   :  { %v125_v27 = vpop.permute.xlu2 %124 }
  0x75   :  { %v57_v21 = vpop.permute.xlu1 %56  ;;  %v49_v22 = vpop.permute.xlu0 %48 }
  0x76   :  { %v79_v23 = vmul.f32 %v49_v22, %v15_v20  ;;  %v81_v39 = vmul.f32 %v57_v21, %v17_v36 }
  0x78   :  { %v143_v24 = vadd.f32 %v113_v19, %v79_v23 }
  0x7a   :  { %151 = vst [vmem:[#allocation2] sm:$0x3] %v143_v24 }
  0x7c   :  { %v137_v35 = vpop.permute.xlu2 %136 }
  0x7d   :  { %v61_v26 = vpop.permute.xlu1 %60 }
  0x7e   :  { %v82_v28 = vmul.f32 %v61_v26, %v18_v25  ;;  %v53_v29 = vpop.permute.xlu0 %52 }
  0x7f   :  { %v80_v40 = vmul.f32 %v53_v29, %v16_v38 }
  0x80   :  { %v146_v30 = vadd.f32 %v125_v27, %v82_v28 }
  0x82   :  { %154 = vst [vmem:[#allocation2 + $0x6] sm:$0x3] %v146_v30 }
  0x85   :  { %v77_v32 = vpop.permute.xlu1 %76 }
  0x86   :  { %v73_v33 = vpop.permute.xlu0 %72  ;;  %v86_v54 = vmul.f32 %v77_v32, %v22_v53 }
  0x87   :  { %v85_v34 = vmul.f32 %v73_v33, %v21_v31 }
  0x89   :  { %v149_v37 = vadd.f32 %v137_v35, %v85_v34 }
  0x8b   :  { %157 = vst [vmem:[#allocation2 + $0xc] sm:$0x3] %v149_v37 }
  0x8d   :  { %v121_v41 = vpop.permute.xlu1 %120 }
  0x8e   :  { %v145_v42 = vadd.f32 %v121_v41, %v81_v39  ;;  %v117_v43 = vpop.permute.xlu0 %116 }
  0x8f   :  { %v144_v44 = vadd.f32 %v117_v43, %v80_v40 }
  0x90   :  { %153 = vst [vmem:[#allocation2 + $0x4] sm:$0x3] %v145_v42 }
  0x91   :  { %152 = vst [vmem:[#allocation2 + $0x2] sm:$0x3] %v144_v44 }
  0x95   :  { %v133_v49 = vpop.permute.xlu1 %132 }
  0x96   :  { %v148_v50 = vadd.f32 %v133_v49, %v84_v47  ;;  %v129_v51 = vpop.permute.xlu0 %128 }
  0x97   :  { %v147_v52 = vadd.f32 %v129_v51, %v83_v48 }
  0x98   :  { %156 = vst [vmem:[#allocation2 + $0xa] sm:$0x3] %v148_v50 }
  0x99   :  { %155 = vst [vmem:[#allocation2 + $0x8] sm:$0x3] %v147_v52 }
  0x9e   :  { %v141_v55 = vpop.permute.xlu0 %140 }
  0x9f   :  { %v150_v56 = vadd.f32 %v141_v55, %v86_v54 }
  0xa1   :  { %158 = vst [vmem:[#allocation2 + $0xe] sm:$0x3] %v150_v56 }
  0xa2   :  { %171 = dma.vmem_to_hbm [thread:$0]  %s164_s5, 256, %s166_s8, [#allocation3], %s228_s9, %s228_s9, %s229_s1  }
  0xa3   :  { %224 = dma.done.wait [#allocation3], 256  }
  0xa4   :  { %225 = vsyncadd [#allocation3], 4294967040 }
  0xa5   :  { %176 = vsyncpa [#allocation3], 1 }

</bundles_post_ra>
